<compile_context>
chip_gen: v7x
topology: tpu7x:2x2x1
jax: 0.10.0
libtpu: 0.0.40
codegen_flags: <defaults>
</compile_context>

<pallas_src>
import jax
import jax.numpy as jnp
from jax.experimental import pallas as pl
from jax.experimental.pallas import tpu as pltpu


def _focus_conv_kernel(x_ref, w_ref, shift_ref, o_ref):
    """One (batch, spatial-tile) step: (OUT,K) @ (K,tm) + shift, then Mish."""
    x = x_ref[0]                                    # (K, tm)
    w = w_ref[...]                                  # (OUT, K), BN scale pre-folded
    y = jnp.dot(w, x, preferred_element_type=jnp.float32)   # MXU -> (OUT, tm)
    y = y + shift_ref[...]                          # (OUT, 1) lane-broadcast BN shift

    # Mish: y * tanh(softplus(y)).  tanh(log1p(e^y)) == t / (t + 2) with
    # t = e^y * (e^y + 2): one EUP exp + one approx EUP reciprocal instead of
    # exp + log1p + tanh (3 EUP pushes).
    e = jnp.exp(jnp.minimum(y, 20.0))               # clamp == PyTorch softplus threshold
    t = e * (e + 2.0)
    o_ref[0] = (y * (t * pl.reciprocal(t + 2.0, approx=True))).astype(o_ref.dtype)


def focus_forward(x, conv_w, bn_gamma, bn_beta, bn_mean, bn_var, eps=1e-5, tm=2048):
    """x: (N, C, H, W) f32.  conv_w: (OUT, 4C, 1, 1).  Returns (N, OUT, H/2, W/2)."""
    n, c, h, w = x.shape
    out_ch = conv_w.shape[0]
    h2, w2 = h // 2, w // 2
    k4 = 4 * c
    s = h2 * w2

    # --- Focus space-to-depth as ONE XLA copy pass (reshape/transpose/reshape).
    # Resulting channel order is (dh, dw, c); the matching permutation is
    # applied to the tiny weight below so the activations are not reshuffled twice.
    x6 = x.reshape(n, c, h2, 2, w2, 2)               # (n, c, h2, dh, w2, dw)
    x_cf = jnp.transpose(x6, (0, 3, 5, 1, 2, 4))     # (n, dh, dw, c, h2, w2)
    x_cf = x_cf.reshape(n, k4, s)                    # (N, 4C, H2*W2)

    # --- Weight: permute groups to (dh, dw) order and fold the BN scale. ---
    # torch Focus group order: [(0,0), (1,0), (0,1), (1,1)]; ours (2*dh+dw): [0,2,1,3].
    w2d = conv_w[:, :, 0, 0].reshape(out_ch, 4, c)[:, jnp.array([0, 2, 1, 3]), :]
    w2d = w2d.reshape(out_ch, k4)
    scale = bn_gamma / jnp.sqrt(bn_var + eps)                     # (OUT,)
    w_fused = (w2d * scale[:, None]).astype(jnp.float32)          # (OUT, 4C)
    shift = (bn_beta - bn_mean * scale).reshape(out_ch, 1).astype(jnp.float32)

    # --- Spatial tiling: fixed lane-aligned tile, pad S if needed (no tm=M fallback).
    if s <= tm:
        tm = s                                      # full spatial extent (allowed as full dim)
    else:
        tm = max(128, (tm // 128) * 128)            # lane-aligned tile
    s_pad = -(-s // tm) * tm
    if s_pad != s:
        x_cf = jnp.pad(x_cf, ((0, 0), (0, 0), (0, s_pad - s)))

    grid = (n, s_pad // tm)

    cost = pl.CostEstimate(
        flops=2 * n * s_pad * k4 * out_ch,
        transcendentals=2 * n * s_pad * out_ch,      # exp + reciprocal per output element
        bytes_accessed=4 * (n * k4 * s_pad + out_ch * k4 + n * out_ch * s_pad),
    )

    out_flat = pl.pallas_call(
        _focus_conv_kernel,
        out_shape=jax.ShapeDtypeStruct((n, out_ch, s_pad), jnp.float32),
        grid_spec=pltpu.PrefetchScalarGridSpec(
            num_scalar_prefetch=0,
            grid=grid,
            in_specs=[
                pl.BlockSpec((1, k4, tm), lambda b, si: (b, 0, si)),    # activations tile
                pl.BlockSpec((out_ch, k4), lambda b, si: (0, 0)),       # fused weight (resident)
                pl.BlockSpec((out_ch, 1), lambda b, si: (0, 0)),        # BN shift (resident)
            ],
            out_specs=pl.BlockSpec((1, out_ch, tm), lambda b, si: (b, 0, si)),
        ),
        compiler_params=pltpu.CompilerParams(
            dimension_semantics=("parallel", "parallel"),   # N and spatial tiles independent
        ),
        cost_estimate=cost,
    )(x_cf, w_fused, shift)

    if s_pad != s:
        out_flat = out_flat[:, :, :s]
    # Output is already NCHW (flattened spatial): no post-kernel transpose.
    return out_flat.reshape(n, out_ch, h2, w2)


def _reference(x, conv_w, bn_gamma, bn_beta, bn_mean, bn_var, eps=1e-5):
    # Faithful to the PyTorch module: cat -> 1x1 conv -> BN(eval) -> Mish.
    foc = jnp.concatenate(
        [x[..., ::2, ::2], x[..., 1::2, ::2], x[..., ::2, 1::2], x[..., 1::2, 1::2]],
        axis=1,
    )
    y = jnp.einsum("nchw,oc->nohw", foc, conv_w[:, :, 0, 0])
    scale = bn_gamma / jnp.sqrt(bn_var + eps)
    shift = bn_beta - bn_mean * scale
    y = y * scale[None, :, None, None] + shift[None, :, None, None]
    sp = jnp.where(y > 20.0, y, jnp.log1p(jnp.exp(jnp.minimum(y, 20.0))))
    return y * jnp.tanh(sp)


if __name__ == "__main__":
    key = jax.random.PRNGKey(0)
    k_x, k_w, k_g, k_b, k_m, k_v = jax.random.split(key, 6)

    N, C, H, W = 2, 4, 16, 16
    OUT = 32
    IN4 = 4 * C  # Focus concatenates 4 subsampled copies along channels

    x = jax.random.normal(k_x, (N, C, H, W), dtype=jnp.float32)

    # Deterministic synthetic parameters (shapes from Focus.__init__ with k=1):
    conv_w = jax.random.normal(k_w, (OUT, IN4, 1, 1), dtype=jnp.float32) * 0.1
    bn_gamma = 1.0 + 0.1 * jax.random.normal(k_g, (OUT,), dtype=jnp.float32)
    bn_beta = 0.1 * jax.random.normal(k_b, (OUT,), dtype=jnp.float32)
    bn_mean = 0.1 * jax.random.normal(k_m, (OUT,), dtype=jnp.float32)
    bn_var = jnp.abs(1.0 + 0.1 * jax.random.normal(k_v, (OUT,), dtype=jnp.float32))

    out = focus_forward(x, conv_w, bn_gamma, bn_beta, bn_mean, bn_var)
    out = jax.block_until_ready(out)

    ref = _reference(x, conv_w, bn_gamma, bn_beta, bn_mean, bn_var)
    assert out.shape == (N, OUT, H // 2, W // 2), out.shape
    # Tolerance 2e-3 accounts for the intentional approx EUP reciprocal in Mish
    # (per perf review); structural errors would be orders of magnitude larger.
    assert jnp.allclose(out, ref, atol=2e-3, rtol=2e-3), float(jnp.max(jnp.abs(out - ref)))

    print("KERNEL_OK")
</pallas_src>

<mosaic_0001>
module attributes {stable_mosaic.version = 11 : i64} {
  func.func @_focus_conv_kernel(%arg0: i32, %arg1: i32, %arg2: memref<1x16x64xf32, #tpu.memory_space<vmem>>, %arg3: memref<32x16xf32, #tpu.memory_space<vmem>>, %arg4: memref<32x1xf32, #tpu.memory_space<vmem>>, %arg5: memref<1x32x64xf32, #tpu.memory_space<vmem>>) attributes {dimension_semantics = [#tpu.dimension_semantics<parallel>, #tpu.dimension_semantics<parallel>], iteration_bounds = array<i64: 2, 1>, scalar_prefetch = 0 : i64, scratch_operands = 0 : i64, tpu.core_type = #tpu.core_type<tc>, window_params = [{transform_indices = @transform_0, window_bounds = array<i64: 1, 16, 64>}, {pipeline_mode = #tpu.pipeline_mode<synchronous>, transform_indices = @transform_1, window_bounds = array<i64: 32, 16>}, {pipeline_mode = #tpu.pipeline_mode<synchronous>, transform_indices = @transform_2, window_bounds = array<i64: 32, 1>}, {transform_indices = @transform_3, window_bounds = array<i64: 1, 32, 64>}]} {
    %c0 = arith.constant 0 : index
    %c0_0 = arith.constant 0 : index
    %c0_1 = arith.constant 0 : index
    %0 = vector.load %arg2[%c0, %c0_0, %c0_1] : memref<1x16x64xf32, #tpu.memory_space<vmem>>, vector<1x16x64xf32>
    %1 = vector.shape_cast %0 : vector<1x16x64xf32> to vector<16x64xf32>
    %c0_2 = arith.constant 0 : index
    %c0_3 = arith.constant 0 : index
    %2 = vector.load %arg3[%c0_2, %c0_3] : memref<32x16xf32, #tpu.memory_space<vmem>>, vector<32x16xf32>
    %cst = arith.constant dense<0.000000e+00> : vector<32x64xf32>
    %3 = tpu.matmul %2, %1, %cst {dimension_numbers = #tpu.dot_dimension_numbers<[1], [0], [0], [1], [0, 0, 1, 1], [], []>} : vector<32x16xf32>, vector<16x64xf32>, vector<32x64xf32> -> vector<32x64xf32>
    %c0_4 = arith.constant 0 : index
    %c0_5 = arith.constant 0 : index
    %4 = vector.load %arg4[%c0_4, %c0_5] : memref<32x1xf32, #tpu.memory_space<vmem>>, vector<32x1xf32>
    %5 = vector.broadcast %4 : vector<32x1xf32> to vector<32x64xf32>
    %6 = arith.addf %3, %5 : vector<32x64xf32>
    %cst_6 = arith.constant 2.000000e+01 : f32
    %7 = vector.broadcast %cst_6 : f32 to vector<32x64xf32>
    %8 = arith.minimumf %6, %7 : vector<32x64xf32>
    %9 = math.exp %8 : vector<32x64xf32>
    %cst_7 = arith.constant 2.000000e+00 : f32
    %10 = vector.broadcast %cst_7 : f32 to vector<32x64xf32>
    %11 = arith.addf %9, %10 : vector<32x64xf32>
    %12 = arith.mulf %9, %11 : vector<32x64xf32>
    %cst_8 = arith.constant 2.000000e+00 : f32
    %13 = vector.broadcast %cst_8 : f32 to vector<32x64xf32>
    %14 = arith.addf %12, %13 : vector<32x64xf32>
    %15 = tpu.reciprocal %14 {approx = true} : vector<32x64xf32> -> vector<32x64xf32>
    %16 = arith.mulf %12, %15 : vector<32x64xf32>
    %17 = arith.mulf %6, %16 : vector<32x64xf32>
    %c0_9 = arith.constant 0 : index
    %c0_10 = arith.constant 0 : index
    %c0_11 = arith.constant 0 : index
    %18 = vector.load %arg5[%c0_9, %c0_10, %c0_11] : memref<1x32x64xf32, #tpu.memory_space<vmem>>, vector<1x32x64xf32>
    %19 = vector.shape_cast %18 : vector<1x32x64xf32> to vector<32x64xf32>
    %20 = vector.shape_cast %17 : vector<32x64xf32> to vector<1x32x64xf32>
    tpu.vector_store %arg5[%c0_9, %c0_10, %c0_11], %20 {strides = array<i32>} : memref<1x32x64xf32, #tpu.memory_space<vmem>>, vector<1x32x64xf32>,
    return
  }
  func.func @transform_0(%arg0: i32, %arg1: i32) -> (i32, i32, i32) {
    %c0_i32 = arith.constant 0 : i32
    %c0_i32_0 = arith.constant 0 : i32
    return %arg0, %c0_i32, %arg1 : i32, i32, i32
  }
  func.func @transform_1(%arg0: i32, %arg1: i32) -> (i32, i32) {
    %c0_i32 = arith.constant 0 : i32
    %c0_i32_0 = arith.constant 0 : i32
    %c0_i32_1 = arith.constant 0 : i32
    return %c0_i32, %c0_i32_0 : i32, i32
  }
  func.func @transform_2(%arg0: i32, %arg1: i32) -> (i32, i32) {
    %c0_i32 = arith.constant 0 : i32
    %c0_i32_0 = arith.constant 0 : i32
    %c0_i32_1 = arith.constant 0 : i32
    return %c0_i32, %c0_i32_0 : i32, i32
  }
  func.func @transform_3(%arg0: i32, %arg1: i32) -> (i32, i32, i32) {
    %c0_i32 = arith.constant 0 : i32
    %c0_i32_0 = arith.constant 0 : i32
    return %arg0, %c0_i32, %arg1 : i32, i32, i32
  }
}

</mosaic_0001>

<bundles_post_ra>
// kernel: tpu_custom_call.1
= control target key start
LH: loop header
LB: loop body
LE: loop exit
PB: predicated region body
PF: predicated region fallthrough
CT: control target
= control target key end

     0   :  { %8 = vsyncpa [#allocation3], 0  ;;  %s824_s0 = inlined_call_operand.vmem [shape: f32[2,16,64], index: 0, kind: input, shape index: {}]   ;;  %s825_s1 = inlined_call_operand.vmem [shape: f32[32,16], index: 1, kind: input, shape index: {}]   ;;  %s826_s2 = inlined_call_operand.vmem [shape: f32[32,1], index: 2, kind: input, shape index: {}]   ;;  %s827_s3 = inlined_call_operand.hbm [shape: f32[2,32,64], index: 3, kind: output, shape index: {}]  }
   0x1   :  { %10 = vsyncpa [#allocation3 + $0x1], 0  ;;  %s677_s12 = smov 0   ;;  %s679_s13 = smov 0  }
   0x2   :  { %s681_s14 = smov 0   ;;  %s683_s15 = smov 0  }
   0x3   :  { %s685_s16 = smov 0   ;;  %s687_s17 = smov 0  }
   0x4 LB: > { %s456_s18 = sadd.s32 4294967295, %s651_s17   ;;  %s457_s19 = sadd.s32 4294967294, %s651_s17   ;;  %s651_s17 = sphi %s687_s17, %s16_s17   ;;  %s647_s16 = sphi %s685_s16, %s834_s16   ;;  %s643_s15 = sphi %s683_s15, %s833_s15   ;;  %s639_s14 = sphi %s681_s14, %s832_s14   ;;  %s635_s13 = sphi %s679_s13, %s831_s13   ;;  %s631_s12 = sphi %s677_s12, %s830_s12  }
   0x5   : > { %s28_s20 = sadd.s32 1, %s647_s16  ;;  %s107_s21 = sadd.s32 1, %s639_s14 }
   0x6   : > { %p30_p0 = scmp.ge.s32.totalorder %s28_s20, 2  ;;  %p117_p1 = scmp.ne.s32.totalorder %s639_s14, %s635_s13 }
   0x7   : > { %p118_p2 = scmp.eq.s32.totalorder %s456_s18, 1  ;;  %p123_p3 = scmp.ne.s32.totalorder %s635_s13, %s631_s12 }
   0x8   : > { %s836_s20 = smov (%p30_p0, %s28_s20), 0  ;;  %p124_p5 = scmp.eq.s32.totalorder %s457_s19, 1 }
   0x9   : > { %p717_p4 = por %p118_p2, %p117_p1  ;;  %s102_s23 = ssub.s32 %s647_s16, %s836_s20 }
   0xa   : > { %p460_p6 = scmp.ge.s32.totalorder %s651_s17, 1  ;;  %p105_p7 = scmp.eq.s32.totalorder %s102_s23, 0 }
   0xb   : > { %p724_p8 = por %p124_p5, %p123_p3  ;;  %p159_p9 = scmp.lt.s32.totalorder %s651_s17, 3 }
   0xc   : > { %s730_s25 = scalar_select %p105_p7, %s639_s14, %s107_s21  }
   0xd   : > { %p160_p10 = pnand %p460_p6, %p159_p9 }
   0xe   : > { %p186_p11 = scmp.lt.s32.totalorder (!%p160_p10), %s643_s15, 1  ;;  %v196_v0 = vld [vmem:[%s825_s1] sm:$0xff] (!%p160_p10)  ;;  %vm224_vm0 = vcmask (!%p160_p10), 130048   ;;  %v198_v1 = vld [vmem:[%s825_s1 + $0x10] sm:$0xff] (!%p160_p10)  ;;  %v653_v4 = vmov (!%p160_p10), 0   ;;  %v203_v5 = vld [vmem:[%s826_s2 + $0x18] sm:$0xff] (!%p160_p10) }
   0xf   : > { %163 = sbr.rel (%p160_p10) target bundleno = 301 (0x12d), region = 32  ;;  %485 = vmatprep.mubr.msk.f32.mxu0 (!%p160_p10), %vm224_vm0, %v196_v0  ;;  %488 = vmatprep.mubr.msk.f32.mxu1 (!%p160_p10), %vm224_vm0, %v198_v1  ;;  %v202_v2 = vld [vmem:[%s826_s2 + $0x10] sm:$0xff] (!%p160_p10)  ;;  %v200_v3 = vld [vmem:[%s826_s2] sm:$0xff] (!%p160_p10)  ;;  %v201_v6 = vld [vmem:[%s826_s2 + $0x8] sm:$0xff] (!%p160_p10)  ;;  %s183_s30 = sand.u32 (!%p160_p10), 1, %s635_s13   ;;  %vm358_vm1 = vcmask (!%p160_p10), 523264  }
  0x10   : > { %556 = vset.pattern.permute.xlu1 (!%p160_p10), %v653_v4  ;;  %555 = vset.pattern.permute.xlu0 (!%p160_p10), %v653_v4  ;;  %v197_v10 = vld [vmem:[%s825_s1 + $0x8] sm:$0xff] (!%p160_p10)  ;;  %v199_v11 = vld [vmem:[%s825_s1 + $0x18] sm:$0xff] (!%p160_p10)  ;;  %s461_s4 = sshll.u32 (!%p160_p10), %s183_s30, 5  ;;  %s654_s18 = smov (!%p160_p10), [#allocation2]  }
  0x11   : > { %216 = vperm.xlu1 (!%p160_p10), %556, %v202_v2   ;;  %206 = vperm.xlu0 (!%p160_p10), %555, %v200_v3   ;;  %s185_s5 = scalar_lea.vmem (!%p160_p10), [#allocation2], %s461_s4  ;;  %s577_s19 = sshll.u32 (!%p160_p10), %s654_s18, 4  ;;  %s578_s19 = int_to_ptr.vmem [resolvable:$false] %s577_s19 }
  0x12   : > { %s378_s6 = sshll.u32 (!%p160_p10), %s185_s5, 4  ;;  %s579_s21 = scalar_lea.vmem (!%p160_p10), %s578_s19, 1024  ;;  %s773_s6 = int_to_ptr.vmem [resolvable:$true] %s378_s6 }
  0x13   : > { %s573_s11 = scalar_lea.vmem (!%p160_p10), %s773_s6, 512  ;;  %p580_p1 = scmp.lt.s32.totalorder (!%p160_p10), %s773_s6, %s578_s19 }
  0x14   : > { %p574_p12 = scmp.ne.s32.totalorder (!%p160_p10), %s773_s6, %s573_s11  ;;  %p581_p2 = scmp.lt.s32.totalorder (!%p160_p10), %s579_s21, %s573_s11 }
  0x15   : > { %221 = vperm.xlu1 (!%p160_p10), %556, %v203_v5   ;;  %211 = vperm.xlu0 (!%p160_p10), %555, %v201_v6  }
  0x16   : > { %s187_s7 = scalar_select %p186_p11, %s643_s15, 1 }
  0x17   : > { %p575_p13 = pnand %p574_p12, %p717_p4  ;;  %p582_p3 = por %p581_p2, %p580_p1 }
  0x18   : > { %s473_s8 = sshll.u32 %s187_s7, 4  ;;  %s474_s7 = sshll.u32 %s643_s15, 9 }
  0x19   : > { %s193_s23 = scalar_lea.vmem %s824_s0, %s473_s8  ;;  %s771_s10 = scalar_lea.hbm %s827_s3, %s474_s7 }
  0x1a   : > { %v194_v7 = vld [vmem:[%s193_s23] sm:$0xff]  ;;  %v195_v8 = vld [vmem:[%s193_s23 + $0x8] sm:$0xff]  ;;  %s778_s15 = scalar_lea.sflag [#allocation3], %s183_s30  ;;  %p576_p0 = pneg %p575_p13 }
  0x1b   : > { %v491_v9 = vpack.c.bf16 %v195_v8, %v194_v7 }
  0x1c   : > { %p583_p5 = pnand %p582_p3, %p576_p0 }
  0x1d   : > { %492 = vmatprep.subr.bf16.mxu0 %v491_v9  ;;  %495 = vmatprep.subr.bf16.mxu1 %v491_v9 }
  0x1e   : > { %494 = vmatpush3.bf16.msra.mxu0 %v491_v9  ;;  %496 = vmatpush3.bf16.msra.mxu1 %v491_v9 }
  0x21   : > { %486 = vmatmul.mubr.msk.f32.vlgmr.msra.gmra.mrb[0].mxu0 %vm224_vm0, %v197_v10  ;;  %489 = vmatmul.mubr.msk.f32.vlgmr.msra.gmra.mrb[0].mxu1 %vm224_vm0, %v199_v11 }
  0x90   : > { %v217_v12 = vpop.permute.xlu1 %216  ;;  %v207_v13 = vpop.permute.xlu0 %206 }
  0x94   : > { %v222_v14 = vpop.permute.xlu1 %221  ;;  %v212_v15 = vpop.permute.xlu0 %211 }
  0xf4   : > { %v487_v16 = vpop.f32.mrb[0].mxu0  ;;  %v490_v17 = vpop.f32.mrb[0].mxu1 }
  0xf5   : > { %v309_v18 = vadd.f32 %v487_v16, %v212_v15  ;;  %v319_v19 = vadd.f32 %v490_v17, %v222_v14  ;;  %v303_v20 = vpop.f32.mrb[1].mxu0  ;;  %v313_v21 = vpop.f32.mrb[1].mxu1 }
  0xf6   : > { %v304_v22 = vadd.f32 %v303_v20, %v207_v13  ;;  %v314_v23 = vadd.f32 %v313_v21, %v217_v12 }
  0xf7   : > { %v323_v24 = vmin.f32 %v309_v18, 20.0  ;;  %v325_v25 = vmin.f32 %v319_v19, 20.0 }
  0xf8   : > { %v322_v26 = vmin.f32 %v304_v22, 20.0  ;;  %v324_v27 = vmin.f32 %v314_v23, 20.0 }
  0xf9   : > { %v328_v28 = vmul.f32 1.442695, %v323_v24  ;;  %v332_v29 = vmul.f32 1.442695, %v325_v25 }
  0xfa   : > { %v326_v30 = vmul.f32 1.442695, %v322_v26  ;;  %v330_v31 = vmul.f32 1.442695, %v324_v27 }
  0xfb   : > { %557 = vpow2.f32 %v328_v28 }
  0xfc   : > { %559 = vpow2.f32 %v332_v29 }
  0xfd   : > { %561 = vpow2.f32 %v326_v30 }
  0xfe   : > { %563 = vpow2.f32 %v330_v31 }
 0x105   : > { %v558_v32 = vpop.eup %557 }
 0x106   : > { %v560_v33 = vpop.eup %559  ;;  %v335_v34 = vadd.f32 2.0, %v558_v32 }
 0x107   : > { %v562_v35 = vpop.eup %561  ;;  %v337_v36 = vadd.f32 2.0, %v560_v33 }
 0x108   : > { %v564_v37 = vpop.eup %563  ;;  %v339_v38 = vmul.f32 %v558_v32, %v335_v34  ;;  %v334_v39 = vadd.f32 2.0, %v562_v35 }
 0x109   : > { %v341_v40 = vmul.f32 %v560_v33, %v337_v36  ;;  %v336_v41 = vadd.f32 2.0, %v564_v37 }
 0x10a   : > { %v343_v42 = vadd.f32 2.0, %v339_v38  ;;  %v338_v43 = vmul.f32 %v562_v35, %v334_v39 }
 0x10b   : > { %v345_v44 = vadd.f32 2.0, %v341_v40  ;;  %v340_v45 = vmul.f32 %v564_v37, %v336_v41 }
 0x10c   : > { %565 = vrcp.f32 %v343_v42  ;;  %v342_v46 = vadd.f32 2.0, %v338_v43 }
 0x10d   : > { %567 = vrcp.f32 %v345_v44  ;;  %v344_v47 = vadd.f32 2.0, %v340_v45 }
 0x10e   : > { %569 = vrcp.f32 %v342_v46 }
 0x10f   : > { %571 = vrcp.f32 %v344_v47 }
 0x116   : > { %v566_v48 = vpop.eup %565 }
 0x117   : > { %v568_v49 = vpop.eup %567  ;;  %v351_v50 = vmul.f32 %v566_v48, %v339_v38 }
 0x118   : > { %v570_v51 = vpop.eup %569  ;;  %v353_v52 = vmul.f32 %v568_v49, %v341_v40 }
 0x119   : > { %v572_v53 = vpop.eup %571  ;;  %v355_v54 = vmul.f32 %v351_v50, %v309_v18  ;;  %v350_v55 = vmul.f32 %v570_v51, %v338_v43 }
 0x11a   : > { %v357_v56 = vmul.f32 %v353_v52, %v319_v19  ;;  %v352_v57 = vmul.f32 %v572_v53, %v340_v45 }
 0x11b   : > { %360 = vst.msk [vmem:[%s185_s5 + $0x8] sm:$0xff] %vm358_vm1, %v355_v54  ;;  %v354_v58 = vmul.f32 %v350_v55, %v304_v22 }
 0x11c   : > { %362 = vst.msk [vmem:[%s185_s5 + $0x18] sm:$0xff] %vm358_vm1, %v357_v56  ;;  %v356_v59 = vmul.f32 %v352_v57, %v314_v23 }
 0x11d   : > { %359 = vst.msk [vmem:[%s185_s5] sm:$0xff] %vm358_vm1, %v354_v58 }
 0x11e   : > { %361 = vst.msk [vmem:[%s185_s5 + $0x10] sm:$0xff] %vm358_vm1, %v356_v59 }
 0x11f   : > { %586 = shalt.err (!%p583_p5)
}
 0x120   : > { %s587_s23 = scalar_lea.hbm %s771_s10, 512  ;;  %s591_s28 = scalar_lea.hbm %s827_s3, 1024 }
 0x121   : > { %p588_p6 = scmp.ne.s32.totalorder %s771_s10, %s587_s23  ;;  %p592_p10 = scmp.lt.u32.totalorder %s771_s10, %s827_s3 }
 0x122   : > { %p593_p11 = scmp.lt.u32.totalorder %s591_s28, %s587_s23  ;;  %p595_p13 = scmp.lt.u32.totalorder %s587_s23, %s771_s10 }
 0x123   : > { %p589_p7 = pnand %p588_p6, %p717_p4 }
 0x124   : > { %p594_p12 = por %p593_p11, %p592_p10 }
 0x125   : > { %p590_p9 = pneg %p589_p7 }
 0x126   : > { %p596_p0 = por %p595_p13, %p594_p12 }
 0x128   : > { %p597_p1 = pnand %p596_p0, %p590_p9 }
 0x12a   : > { %600 = shalt.err (!%p597_p1)
}
 0x12b   : > { %s655_s4 = smov 128   ;;  %s656_s5 = smov 8  }
 0x12c   : > { %497 = dma.vmem_to_hbm [thread:$0]  (%p717_p4), %s773_s6, 512, %s771_s10, %s778_s15, %s655_s4, %s655_s4, %s656_s5  }
 0x12d PF: > { %p503_p2 = scmp.ge.s32.totalorder %s651_s17, 2  ;;  %s393_s7 = sand.u32 1, %s631_s12  }
 0x12e   : > { %s394_s8 = scalar_lea.sflag [#allocation3], %s393_s7 }
 0x12f   : > { %p500_p3 = pnand %p503_p2, %p724_p8 }
 0x131   : > { %626 = dma.done.wait (!%p500_p3), %s394_s8, 512  }
 0x132   : > { %628 = vsyncadd (!%p500_p3), %s394_s8, 4294966784  ;;  %s16_s17 = sadd.s32 1, %s651_s17   ;;  %s830_s12 = smov %s635_s13 }
 0x133   : > { %p13_p5 = scmp.ge.s32.totalorder %s16_s17, 4   ;;  %s831_s13 = smov %s639_s14 }
 0x134   : > { %s832_s14 = smov %s730_s25  ;;  %s833_s15 = smov %s647_s16 }
 0x135   : > { %s834_s16 = smov %s836_s20  ;;  %15 = sbr.rel (!%p13_p5) target bundleno = 4 (0x4), region = 67 }
 0x13c   :  { %399 = vsyncpa [#allocation3], 1 }
 0x13d   :  { %401 = vsyncpa [#allocation3 + $0x1], 1 }

</bundles_post_ra>
